<compile_context>
chip_gen: v7x
topology: tpu7x:2x2x1
jax: 0.10.0
libtpu: 0.0.40
codegen_flags: <defaults>
</compile_context>

<pallas_src>
import functools

import jax
import jax.numpy as jnp
from jax import lax
from jax.experimental import pallas as pl
from jax.experimental.pallas import tpu as pltpu

LANE = 128
SUBLANE = 8
MASK_BIG = 9e15       # matches the reference's -9e15 mask value
NEG_INIT = -1e30      # finite "minus infinity" for running-max init


def _round_up(x, m):
    return ((x + m - 1) // m) * m


def _pick_tile(n, target, align):
    """Largest tile <= target that is a multiple of `align` and divides n.

    Falls back to the full dimension (always a legal block shape)."""
    if n <= target:
        return n
    t = (target // align) * align
    while t >= align:
        if n % t == 0:
            return t
        t -= align
    return n


def _compiler_params(dims):
    return pltpu.CompilerParams(
        dimension_semantics=dims,
        vmem_limit_bytes=48 * 1024 * 1024,  # within v7x's 64 MiB physical VMEM
    )


# --------------------------------------------------------------------------- #
# Projection kernel: Wh_all = x @ W_all plus both per-node logit terms.        #
#   wh  : [N, O_pad]  bf16   (all heads concatenated, lane-dense)              #
#   f1  : [N, H]      f32    (Wh @ a1^T  — query-side logit term)              #
#   f2t : [H, N]      f32    (a2 @ Wh^T  — neighbor-side logit term, already   #
#                             transposed so attention never transposes)        #
# --------------------------------------------------------------------------- #
def _project_kernel(x_ref, w_ref, a1_ref, a2_ref, wh_ref, f1_ref, f2t_ref):
    x = x_ref[...].astype(jnp.bfloat16)
    w = w_ref[...].astype(jnp.bfloat16)
    wh = jnp.dot(x, w, preferred_element_type=jnp.float32)        # [tm, O_pad]
    wh_bf = wh.astype(jnp.bfloat16)
    wh_ref[...] = wh_bf

    a1 = a1_ref[...].astype(jnp.bfloat16)                         # [H, O_pad]
    a2 = a2_ref[...].astype(jnp.bfloat16)                         # [H, O_pad]
    dnums = (((1,), (1,)), ((), ()))                              # contract feature axis
    f1_ref[...] = lax.dot_general(wh_bf, a1, dnums,
                                  preferred_element_type=jnp.float32)   # [tm, H]
    f2t_ref[...] = lax.dot_general(a2, wh_bf, dnums,
                                   preferred_element_type=jnp.float32)  # [H, tm]


def project(x, w_pad, a1_pad, a2_pad, *, tm):
    n, f = x.shape
    o_pad = w_pad.shape[1]
    h = a1_pad.shape[0]
    return pl.pallas_call(
        _project_kernel,
        out_shape=(
            jax.ShapeDtypeStruct((n, o_pad), jnp.bfloat16),
            jax.ShapeDtypeStruct((n, h), jnp.float32),
            jax.ShapeDtypeStruct((h, n), jnp.float32),
        ),
        grid=(n // tm,),
        in_specs=[
            pl.BlockSpec((tm, f), lambda i: (i, 0)),
            pl.BlockSpec((f, o_pad), lambda i: (0, 0)),
            pl.BlockSpec((h, o_pad), lambda i: (0, 0)),
            pl.BlockSpec((h, o_pad), lambda i: (0, 0)),
        ],
        out_specs=(
            pl.BlockSpec((tm, o_pad), lambda i: (i, 0)),
            pl.BlockSpec((tm, h), lambda i: (i, 0)),
            pl.BlockSpec((h, tm), lambda i: (0, i)),
        ),
        compiler_params=_compiler_params(("parallel",)),
    )(x, w_pad, a1_pad, a2_pad)


# --------------------------------------------------------------------------- #
# Fused multi-head attention kernel with online softmax over neighbor tiles.  #
# --------------------------------------------------------------------------- #
def _attention_kernel(adj_ref, whk_ref, f1_ref, f2t_ref, o_ref,
                      m_ref, l_ref, acc_ref,
                      *, alpha, n_head, n_hid, n_valid, concat, final):
    k_idx = pl.program_id(1)
    n_k = pl.num_programs(1)

    @pl.when(k_idx == 0)
    def _init():
        m_ref[...] = jnp.full_like(m_ref, NEG_INIT)
        l_ref[...] = jnp.zeros_like(l_ref)
        acc_ref[...] = jnp.zeros_like(acc_ref)

    # int8 adjacency tile -> arithmetic mask (no extra full-tile select).
    adj_f = adj_ref[...].astype(jnp.float32)            # [tm, tk], 0/1
    neg = (1.0 - adj_f) * MASK_BIG                      # [tm, tk]

    whk = whk_ref[...]                                  # [tk, O_pad] bf16 (neighbor rows)
    f1 = f1_ref[...]                                    # [tm, H] f32 (precomputed)
    f2t = f2t_ref[...]                                  # [H, tk] f32 (precomputed)

    for h in range(n_head):
        e = f1[:, h:h + 1] + f2t[h:h + 1, :]            # [tm, tk]
        e = jnp.where(e > 0, e, alpha * e)              # LeakyReLU(alpha)
        s = e - neg                                     # masked logits

        m_prev = m_ref[:, pl.ds(h, 1)]                  # [tm, 1]
        l_prev = l_ref[:, pl.ds(h, 1)]                  # [tm, 1]
        m_new = jnp.maximum(m_prev, jnp.max(s, axis=-1, keepdims=True))
        corr = jnp.exp(m_prev - m_new)
        p = jnp.exp(s - m_new)                          # masked entries -> exactly 0

        l_ref[:, pl.ds(h, 1)] = corr * l_prev + jnp.sum(p, axis=-1, keepdims=True)

        whk_h = whk[:, h * n_hid:(h + 1) * n_hid]       # [tk, n_hid] bf16
        pv = jnp.dot(p.astype(jnp.bfloat16), whk_h,
                     preferred_element_type=jnp.float32)        # [tm, n_hid]
        col = pl.ds(h * n_hid, n_hid)
        acc_ref[:, col] = corr * acc_ref[:, col] + pv
        m_ref[:, pl.ds(h, 1)] = m_new

    @pl.when(k_idx == n_k - 1)
    def _finalize():
        inv_l = pl.reciprocal(l_ref[...], approx=True)  # [tm, H] in one EUP pass
        for h in range(n_head):
            col = pl.ds(h * n_hid, n_hid)
            acc_ref[:, col] = acc_ref[:, col] * inv_l[:, h:h + 1]
        res = acc_ref[...]                              # [tm, O_pad] (padded cols are 0)
        if concat or final:
            # ELU; clamp the unselected branch's argument so exp never overflows.
            res = jnp.where(res > 0, res, jnp.exp(jnp.minimum(res, 0.0)) - 1.0)
        if final:
            # log_softmax over the n_valid real classes only (padded lanes masked).
            cols = lax.broadcasted_iota(jnp.int32, res.shape, 1)
            masked = jnp.where(cols < n_valid, res, NEG_INIT)
            mx = jnp.max(masked, axis=-1, keepdims=True)
            lse = mx + jnp.log(jnp.sum(jnp.exp(masked - mx), axis=-1, keepdims=True))
            res = res - lse
        o_ref[...] = res.astype(o_ref.dtype)


def attention(adj_i8, wh, f1, f2t, *, alpha, n_head, n_hid, concat, final, tm, tk):
    n = adj_i8.shape[0]
    o_pad = wh.shape[1]
    kernel = functools.partial(
        _attention_kernel, alpha=alpha, n_head=n_head, n_hid=n_hid,
        n_valid=n_head * n_hid, concat=concat, final=final)
    return pl.pallas_call(
        kernel,
        out_shape=jax.ShapeDtypeStruct((n, o_pad), jnp.float32),
        grid=(n // tm, n // tk),
        in_specs=[
            pl.BlockSpec((tm, tk), lambda i, k: (i, k)),          # adj tile (int8)
            pl.BlockSpec((tk, o_pad), lambda i, k: (k, 0)),       # Wh, neighbor rows
            pl.BlockSpec((tm, n_head), lambda i, k: (i, 0)),      # f1 (query logits)
            pl.BlockSpec((n_head, tk), lambda i, k: (0, k)),      # f2^T (neighbor logits)
        ],
        out_specs=pl.BlockSpec((tm, o_pad), lambda i, k: (i, 0)),
        scratch_shapes=[
            pltpu.VMEM((tm, n_head), jnp.float32),   # running max   (per head)
            pltpu.VMEM((tm, n_head), jnp.float32),   # running denom (per head)
            pltpu.VMEM((tm, o_pad), jnp.float32),    # output accumulator
        ],
        compiler_params=_compiler_params(("parallel", "arbitrary")),
    )(adj_i8, wh, f1, f2t)


def gat_layer(x, adj_i8, w_pad, a1_pad, a2_pad, *, alpha, n_head, n_hid,
              concat, final):
    n = x.shape[0]
    # tm feeds a lane (last) dimension of the f2t projection output, so align
    # it to 128 (or full N); tk is the neighbor-tile lane dimension.
    tm = _pick_tile(n, 256, LANE)      # row tile  (sized for v7x 64 MiB VMEM too)
    tk = _pick_tile(n, 512, LANE)      # neighbor tile
    wh, f1, f2t = project(x, w_pad, a1_pad, a2_pad, tm=tm)   # computed once
    return attention(adj_i8, wh, f1, f2t, alpha=alpha, n_head=n_head,
                     n_hid=n_hid, concat=concat, final=final, tm=tm, tk=tk)


# --------------------------------------------------------------------------- #
# Parameters (heads fused into padded, lane-dense slabs) and forward pass.    #
# --------------------------------------------------------------------------- #
def init_gat_params(key, n_feature, n_hid, n_class, n_head):
    hid_total = n_head * n_hid
    hid_pad = _round_up(hid_total, LANE)
    cls_pad = _round_up(n_class, LANE)

    keys = jax.random.split(key, 2 * n_head + 2)

    w_all = jnp.zeros((n_feature, hid_pad), jnp.float32)
    a1_all = jnp.zeros((n_head, hid_pad), jnp.float32)
    a2_all = jnp.zeros((n_head, hid_pad), jnp.float32)
    heads_raw = []
    for h in range(n_head):
        w = jax.random.normal(keys[2 * h], (n_feature, n_hid), jnp.float32) * 0.1
        a = jax.random.normal(keys[2 * h + 1], (1, 2 * n_hid), jnp.float32) * 0.1
        heads_raw.append((w, a))
        sl = slice(h * n_hid, (h + 1) * n_hid)
        w_all = w_all.at[:, sl].set(w)
        a1_all = a1_all.at[h, sl].set(a[0, :n_hid])
        a2_all = a2_all.at[h, sl].set(a[0, n_hid:])

    w_out = jax.random.normal(keys[-2], (hid_total, n_class), jnp.float32) * 0.1
    a_out = jax.random.normal(keys[-1], (1, 2 * n_class), jnp.float32) * 0.1
    w_out_pad = jnp.zeros((hid_pad, cls_pad), jnp.float32)
    w_out_pad = w_out_pad.at[:hid_total, :n_class].set(w_out)
    a1_out = jnp.zeros((1, cls_pad), jnp.float32).at[0, :n_class].set(a_out[0, :n_class])
    a2_out = jnp.zeros((1, cls_pad), jnp.float32).at[0, :n_class].set(a_out[0, n_class:])

    return dict(w_all=w_all, a1_all=a1_all, a2_all=a2_all,
                w_out=w_out_pad, a1_out=a1_out, a2_out=a2_out,
                raw=dict(heads=heads_raw, out=(w_out, a_out)))


def gat_forward(x, adj, params, *, alpha, n_head, n_hid, n_class):
    adj_i8 = (adj > 0).astype(jnp.int8)     # adjacency only ever used as adj > 0
    # x = dropout(x) -> identity in eval mode
    hidden = gat_layer(x, adj_i8, params["w_all"], params["a1_all"],
                       params["a2_all"], alpha=alpha, n_head=n_head,
                       n_hid=n_hid, concat=True, final=False)
    # hidden: [N, hid_pad]; padded columns are exactly 0 and w_out has zero rows there
    # hidden = dropout(hidden) -> identity in eval mode
    out = gat_layer(hidden, adj_i8, params["w_out"], params["a1_out"],
                    params["a2_out"], alpha=alpha, n_head=1, n_hid=n_class,
                    concat=False, final=True)
    return out[:, :n_class]


# --------------------------------------------------------------------------- #
# Pure-JAX reference (f32) for validation.                                     #
# --------------------------------------------------------------------------- #
def _ref_layer(x, adj, w, a, alpha, concat):
    wh = x @ w
    o = w.shape[1]
    f1 = wh @ a[:, :o].T
    f2 = wh @ a[:, o:].T
    e = f1 + f2.T
    e = jnp.where(e > 0, e, alpha * e)
    e = jnp.where(adj > 0, e, -9e15)
    att = jax.nn.softmax(e, axis=1)
    h = att @ wh
    return jax.nn.elu(h) if concat else h


def gat_reference(x, adj, params, alpha):
    hs = [_ref_layer(x, adj, w, a, alpha, True) for (w, a) in params["raw"]["heads"]]
    h = jnp.concatenate(hs, axis=1)
    w_out, a_out = params["raw"]["out"]
    out = jax.nn.elu(_ref_layer(h, adj, w_out, a_out, alpha, False))
    return jax.nn.log_softmax(out, axis=1)


if __name__ == "__main__":
    N, N_FEATURE, N_HID, N_CLASS, N_HEAD = 8, 16, 8, 4, 2
    ALPHA, DROPOUT = 0.2, 0.6   # dropout unused (eval mode)

    key = jax.random.PRNGKey(0)
    kx, kadj, kp = jax.random.split(key, 3)

    x = jax.random.normal(kx, (N, N_FEATURE), jnp.float32)
    adj = (jax.random.uniform(kadj, (N, N)) > 0.5).astype(jnp.float32)
    adj = jnp.maximum(adj, jnp.eye(N, dtype=jnp.float32))   # self-loops

    params = init_gat_params(kp, N_FEATURE, N_HID, N_CLASS, N_HEAD)

    out = gat_forward(x, adj, params, alpha=ALPHA, n_head=N_HEAD,
                      n_hid=N_HID, n_class=N_CLASS)
    out = jax.block_until_ready(out)
    assert out.shape == (N, N_CLASS)
    assert bool(jnp.all(jnp.isfinite(out)))

    ref = gat_reference(x, adj, params, ALPHA)
    assert bool(jnp.allclose(out, ref, atol=5e-2, rtol=5e-2)), \
        float(jnp.max(jnp.abs(out - ref)))

    print("KERNEL_OK")
</pallas_src>

<mosaic_0001>
module attributes {stable_mosaic.version = 11 : i64} {
  func.func @_project_kernel(%arg0: i32, %arg1: memref<8x16xf32, #tpu.memory_space<vmem>>, %arg2: memref<16x128xf32, #tpu.memory_space<vmem>>, %arg3: memref<2x128xf32, #tpu.memory_space<vmem>>, %arg4: memref<2x128xf32, #tpu.memory_space<vmem>>, %arg5: memref<8x128xbf16, #tpu.memory_space<vmem>>, %arg6: memref<8x2xf32, #tpu.memory_space<vmem>>, %arg7: memref<2x8xf32, #tpu.memory_space<vmem>>) attributes {dimension_semantics = [#tpu.dimension_semantics<parallel>], iteration_bounds = array<i64: 1>, scalar_prefetch = 0 : i64, scratch_operands = 0 : i64, tpu.core_type = #tpu.core_type<tc>, window_params = [{transform_indices = @transform_0, window_bounds = array<i64: 8, 16>}, {pipeline_mode = #tpu.pipeline_mode<synchronous>, transform_indices = @transform_1, window_bounds = array<i64: 16, 128>}, {pipeline_mode = #tpu.pipeline_mode<synchronous>, transform_indices = @transform_2, window_bounds = array<i64: 2, 128>}, {pipeline_mode = #tpu.pipeline_mode<synchronous>, transform_indices = @transform_3, window_bounds = array<i64: 2, 128>}, {transform_indices = @transform_4, window_bounds = array<i64: 8, 128>}, {transform_indices = @transform_5, window_bounds = array<i64: 8, 2>}, {transform_indices = @transform_6, window_bounds = array<i64: 2, 8>}]} {
    %c0 = arith.constant 0 : index
    %c0_0 = arith.constant 0 : index
    %0 = vector.load %arg1[%c0, %c0_0] : memref<8x16xf32, #tpu.memory_space<vmem>>, vector<8x16xf32>
    %1 = arith.truncf %0 : vector<8x16xf32> to vector<8x16xbf16>
    %c0_1 = arith.constant 0 : index
    %c0_2 = arith.constant 0 : index
    %2 = vector.load %arg2[%c0_1, %c0_2] : memref<16x128xf32, #tpu.memory_space<vmem>>, vector<16x128xf32>
    %3 = arith.truncf %2 : vector<16x128xf32> to vector<16x128xbf16>
    %cst = arith.constant dense<0.000000e+00> : vector<8x128xf32>
    %4 = tpu.matmul %1, %3, %cst {dimension_numbers = #tpu.dot_dimension_numbers<[1], [0], [0], [1], [0, 0, 1, 1], [], []>} : vector<8x16xbf16>, vector<16x128xbf16>, vector<8x128xf32> -> vector<8x128xf32>
    %5 = arith.truncf %4 : vector<8x128xf32> to vector<8x128xbf16>
    %c0_3 = arith.constant 0 : index
    %c0_4 = arith.constant 0 : index
    %6 = vector.load %arg5[%c0_3, %c0_4] : memref<8x128xbf16, #tpu.memory_space<vmem>>, vector<8x128xbf16>
    tpu.vector_store %arg5[%c0_3, %c0_4], %5 {strides = array<i32>} : memref<8x128xbf16, #tpu.memory_space<vmem>>, vector<8x128xbf16>,
    %c0_5 = arith.constant 0 : index
    %c0_6 = arith.constant 0 : index
    %7 = vector.load %arg3[%c0_5, %c0_6] : memref<2x128xf32, #tpu.memory_space<vmem>>, vector<2x128xf32>
    %8 = arith.truncf %7 : vector<2x128xf32> to vector<2x128xbf16>
    %c0_7 = arith.constant 0 : index
    %c0_8 = arith.constant 0 : index
    %9 = vector.load %arg4[%c0_7, %c0_8] : memref<2x128xf32, #tpu.memory_space<vmem>>, vector<2x128xf32>
    %10 = arith.truncf %9 : vector<2x128xf32> to vector<2x128xbf16>
    %cst_9 = arith.constant dense<0.000000e+00> : vector<8x2xf32>
    %11 = tpu.matmul %5, %8, %cst_9 {dimension_numbers = #tpu.dot_dimension_numbers<[1], [1], [0], [0], [0, 0, 1, 0], [], []>} : vector<8x128xbf16>, vector<2x128xbf16>, vector<8x2xf32> -> vector<8x2xf32>
    %c0_10 = arith.constant 0 : index
    %c0_11 = arith.constant 0 : index
    %12 = vector.load %arg6[%c0_10, %c0_11] : memref<8x2xf32, #tpu.memory_space<vmem>>, vector<8x2xf32>
    tpu.vector_store %arg6[%c0_10, %c0_11], %11 {strides = array<i32>} : memref<8x2xf32, #tpu.memory_space<vmem>>, vector<8x2xf32>,
    %cst_12 = arith.constant dense<0.000000e+00> : vector<2x8xf32>
    %13 = tpu.matmul %10, %5, %cst_12 {dimension_numbers = #tpu.dot_dimension_numbers<[1], [1], [0], [0], [0, 0, 1, 0], [], []>} : vector<2x128xbf16>, vector<8x128xbf16>, vector<2x8xf32> -> vector<2x8xf32>
    %c0_13 = arith.constant 0 : index
    %c0_14 = arith.constant 0 : index
    %14 = vector.load %arg7[%c0_13, %c0_14] : memref<2x8xf32, #tpu.memory_space<vmem>>, vector<2x8xf32>
    tpu.vector_store %arg7[%c0_13, %c0_14], %13 {strides = array<i32>} : memref<2x8xf32, #tpu.memory_space<vmem>>, vector<2x8xf32>,
    return
  }
  func.func @transform_0(%arg0: i32) -> (i32, i32) {
    %c0_i32 = arith.constant 0 : i32
    %c0_i32_0 = arith.constant 0 : i32
    return %arg0, %c0_i32 : i32, i32
  }
  func.func @transform_1(%arg0: i32) -> (i32, i32) {
    %c0_i32 = arith.constant 0 : i32
    %c0_i32_0 = arith.constant 0 : i32
    %c0_i32_1 = arith.constant 0 : i32
    return %c0_i32, %c0_i32_0 : i32, i32
  }
  func.func @transform_2(%arg0: i32) -> (i32, i32) {
    %c0_i32 = arith.constant 0 : i32
    %c0_i32_0 = arith.constant 0 : i32
    %c0_i32_1 = arith.constant 0 : i32
    return %c0_i32, %c0_i32_0 : i32, i32
  }
  func.func @transform_3(%arg0: i32) -> (i32, i32) {
    %c0_i32 = arith.constant 0 : i32
    %c0_i32_0 = arith.constant 0 : i32
    %c0_i32_1 = arith.constant 0 : i32
    return %c0_i32, %c0_i32_0 : i32, i32
  }
  func.func @transform_4(%arg0: i32) -> (i32, i32) {
    %c0_i32 = arith.constant 0 : i32
    %c0_i32_0 = arith.constant 0 : i32
    return %arg0, %c0_i32 : i32, i32
  }
  func.func @transform_5(%arg0: i32) -> (i32, i32) {
    %c0_i32 = arith.constant 0 : i32
    %c0_i32_0 = arith.constant 0 : i32
    return %arg0, %c0_i32 : i32, i32
  }
  func.func @transform_6(%arg0: i32) -> (i32, i32) {
    %c0_i32 = arith.constant 0 : i32
    %c0_i32_0 = arith.constant 0 : i32
    return %c0_i32, %arg0 : i32, i32
  }
}

</mosaic_0001>

<bundles_post_ra>
// kernel: tpu_custom_call.1
= control target key start
LH: loop header
LB: loop body
LE: loop exit
PB: predicated region body
PF: predicated region fallthrough
CT: control target
= control target key end

     0   :  { %12 = vsyncpa [#allocation3], 0  ;;  %s461_s0 = inlined_call_operand.hbm [shape: f32[8,16], index: 0, kind: input, shape index: {}]   ;;  %s462_s1 = inlined_call_operand.hbm [shape: f32[16,128], index: 1, kind: input, shape index: {}]   ;;  %s463_s2 = inlined_call_operand.vmem [shape: f32[2,128], index: 2, kind: input, shape index: {}]   ;;  %s464_s3 = inlined_call_operand.vmem [shape: f32[2,128], index: 3, kind: input, shape index: {}]   ;;  %s465_s4 = inlined_call_operand.hbm [shape: bf16[8,128], index: 4, kind: output, shape index: {0}]   ;;  %s466_s5 = inlined_call_operand.vmem [shape: f32[8,2], index: 5, kind: output, shape index: {1}]   ;;  %s467_s6 = inlined_call_operand.hbm [shape: f32[2,8], index: 6, kind: output, shape index: {2}]  }
   0x1   :  { %13 = vsyncpa [#allocation6], 0 }
   0x2   :  { %14 = vsyncpa [#allocation4], 0 }
   0x3   :  { %15 = vsyncpa [#allocation9], 0  ;;  %s351_s21 = smov [#allocation2]   ;;  %s352_s23 = smov [#allocation5]  }
   0x4   :  { %s22_s22 = sshll.u32 %s351_s21, 4  ;;  %s31_s24 = sshll.u32 %s352_s23, 4  ;;  %s23_s22 = int_to_ptr.vmem [resolvable:$true] %s22_s22  ;;  %s394_s24 = int_to_ptr.vmem [resolvable:$true] %s31_s24 }
   0x5   :  { %s255_s27 = scalar_lea.hbm %s461_s0, 128 }
   0x6   :  { %p256_p0 = scmp.ne.s32.totalorder %s461_s0, %s255_s27  ;;  %p259_p1 = scmp.lt.u32.totalorder %s255_s27, %s461_s0 }
   0x8   :  { %p261_p2 = pnand %p259_p1, %p256_p0 }
   0xa   :  { %264 = shalt.err (!%p261_p2)
}
   0xb   :  { %s265_s8 = scalar_lea.vmem %s23_s22, 128  ;;  %p270_p4 = scmp.lt.s32.totalorder %s23_s22, %s23_s22 }
   0xc   :  { %p266_p3 = scmp.ne.s32.totalorder %s23_s22, %s265_s8  ;;  %p271_p5 = scmp.lt.s32.totalorder %s265_s8, %s265_s8 }
   0xe   :  { %p272_p6 = por %p271_p5, %p270_p4 }
  0x10   :  { %p273_p7 = pnand %p272_p6, %p266_p3 }
  0x12   :  { %276 = shalt.err (!%p273_p7)
}
  0x13   :  { %25 = dma.hbm_to_vmem [thread:$0]  %s461_s0, 128, %s23_s22, [#allocation3]  }
  0x14   :  { %s277_s13 = scalar_lea.hbm %s462_s1, 256 }
  0x15   :  { %p278_p8 = scmp.ne.s32.totalorder %s462_s1, %s277_s13  ;;  %p281_p9 = scmp.lt.u32.totalorder %s277_s13, %s462_s1 }
  0x17   :  { %p283_p10 = pnand %p281_p9, %p278_p8 }
  0x19   :  { %286 = shalt.err (!%p283_p10)
}
  0x1a   :  { %s287_s18 = scalar_lea.vmem %s394_s24, 256  ;;  %p292_p12 = scmp.lt.s32.totalorder %s394_s24, %s394_s24 }
  0x1b   :  { %p288_p11 = scmp.ne.s32.totalorder %s394_s24, %s287_s18  ;;  %p293_p13 = scmp.lt.s32.totalorder %s287_s18, %s287_s18 }
  0x1d   :  { %p294_p0 = por %p293_p13, %p292_p12 }
  0x1f   :  { %p295_p1 = pnand %p294_p0, %p288_p11 }
  0x21   :  { %298 = shalt.err (!%p295_p1)
}
  0x22   :  { %s353_s0 = smov 128   ;;  %s354_s19 = smov 8  }
  0x23   :  { %37 = dma.hbm_to_vmem [thread:$0]  %s462_s1, 256, %s394_s24, [#allocation6], %s353_s0, %s353_s0, %s354_s19  }
  0x24   :  { %343 = dma.done.wait [#allocation3], 128  }
  0x25   :  { %344 = vsyncadd [#allocation3], 4294967168 }
  0x26   :  { %345 = dma.done.wait [#allocation6], 256  }
  0x27   :  { %346 = vsyncadd [#allocation6], 4294967040  ;;  %v355_v0 = vmov 0.0   ;;  %vm356_vm0 = vmmov 0   ;;  %v51_v1 = vld [vmem:[#allocation5] sm:$0xff]  ;;  %v52_v2 = vld [vmem:[#allocation5 + $0x8] sm:$0xff] }
  0x28   :  { %229 = vmatprep.subr.bf16.mxu0 %v355_v0  ;;  %231 = vmatprep.mubr.msk.bf16.mxu0 %vm356_vm0, %v355_v0  ;;  %v49_v3 = vld [vmem:[#allocation2] sm:$0xff]  ;;  %v53_v4 = vpack.c.bf16 %v52_v2, %v51_v1  ;;  %vm54_vm1 = vcmask 130048  }
  0x29   :  { %235 = vmatprep.subr.bf16.mxu1 %v355_v0  ;;  %237 = vmatprep.mubr.msk.bf16.mxu1 %vm356_vm0, %v355_v0  ;;  %v100_v5 = vld [vmem:[%s463_s2] sm:$0x3]  ;;  %v50_v6 = vpack.c.bf16 %v49_v3, %v49_v3  ;;  %s357_s2 = smov [#allocation7]  }
  0x2a   :  { %v101_v7 = vpack.c.bf16 %v100_v5, %v100_v5  ;;  %230 = vmatpush3.bf16.msra.mxu0 %v53_v4  ;;  %v102_v13 = vld [vmem:[%s464_s3] sm:$0x3]  ;;  %s194_s25 = sshll.u32 %s357_s2, 4  ;;  %s195_s25 = int_to_ptr.vmem [resolvable:$true] %s194_s25 }
  0x2b   :  { %241 = vmatprep.subr.bf16.mxu0 %v355_v0  ;;  %v103_v14 = vpack.c.bf16 %v102_v13, %v102_v13  ;;  %s299_s26 = scalar_lea.vmem %s195_s25, 64  ;;  %p304_p3 = scmp.lt.s32.totalorder %s195_s25, %s195_s25 }
  0x2c   :  { %236 = vmatpush3.bf16.xpose.msra.mxu1 %v101_v7  ;;  %p300_p2 = scmp.ne.s32.totalorder %s195_s25, %s299_s26  ;;  %p305_p4 = scmp.lt.s32.totalorder %s299_s26, %s299_s26 }
  0x2d   :  { %232 = vmatmul.mubr.msk.bf16.vlgmr.msra.gmra.mrb[0].mxu0 %vm54_vm1, %v50_v6 }
  0x2e   :  { %243 = vmatprep.mubr.msk.bf16.mxu0 %vm356_vm0, %v355_v0  ;;  %p306_p5 = por %p305_p4, %p304_p3 }
  0x30   :  { %p307_p6 = pnand %p306_p5, %p300_p2 }
 0x100   :  { %v92_v8 = vpop.f32.mrb[0].mxu0 }
 0x101   :  { %v98_v9 = vpack.c.bf16 %v92_v8, %v92_v8  ;;  %v233_v10 = vpop.f32.mrb[1].mxu0 }
 0x102   :  { %v95_v11 = vpop.f32.mrb[2].mxu0 }
 0x103   :  { %99 = vst [vmem:[#allocation7] sm:$0xf] %v98_v9  ;;  %v234_v12 = vpop.f32.mrb[3].mxu0  ;;  %238 = vmatmul.mubr.bf16.vlgmr.msra.gmra.mrb[0].mxu1 %v98_v9  ;;  %242 = vmatpush3.bf16.xpose.msra.mxu0 %v98_v9 }
 0x10a   :  { %244 = vmatmul.mubr.bf16.vlgmr.msra.gmra.mrb[4].mxu0 %v103_v14 }
 0x10b   :  { %310 = shalt.err (!%p307_p6)
}
 0x10c   :  { %s311_s29 = scalar_lea.hbm %s465_s4, 64 }
 0x10d   :  { %p312_p7 = scmp.ne.s32.totalorder %s465_s4, %s311_s29  ;;  %p315_p8 = scmp.lt.u32.totalorder %s311_s29, %s465_s4 }
 0x10f   :  { %p317_p9 = pnand %p315_p8, %p312_p7 }
 0x111   :  { %320 = shalt.err (!%p317_p9)
}
 0x112   :  { %197 = dma.vmem_to_hbm [thread:$0]  %s195_s25, 64, %s465_s4, [#allocation4]   ;;  %vm144_vm2 = vcmask 15360   ;;  %vm186_vm3 = vcmask 58368  }
 0x113   :  { %s358_s13 = smov [#allocation8]  }
 0x114   :  { %s206_s14 = sshll.u32 %s358_s13, 4  ;;  %s207_s14 = int_to_ptr.vmem [resolvable:$true] %s206_s14 }
 0x115   :  { %s321_s15 = scalar_lea.vmem %s207_s14, 32  ;;  %p326_p11 = scmp.lt.s32.totalorder %s207_s14, %s207_s14 }
 0x116   :  { %p322_p10 = scmp.ne.s32.totalorder %s207_s14, %s321_s15  ;;  %p327_p12 = scmp.lt.s32.totalorder %s321_s15, %s321_s15 }
 0x118   :  { %p328_p13 = por %p327_p12, %p326_p11 }
 0x11a   :  { %p329_p0 = pnand %p328_p13, %p322_p10 }
 0x1d6   :  { %v138_v15 = vpop.f32.mrb[0].mxu1 }
 0x1d7   :  { %145 = vst.msk [vmem:[%s466_s5] sm:$0xff] %vm144_vm2, %v138_v15  ;;  %v239_v16 = vpop.f32.mrb[1].mxu1 }
 0x1d8   :  { %v141_v17 = vpop.f32.mrb[2].mxu1 }
 0x1d9   :  { %v240_v18 = vpop.f32.mrb[3].mxu1 }
 0x1dd   :  { %v180_v19 = vpop.f32.mrb[4].mxu0 }
 0x1de   :  { %v245_v20 = vpop.f32.mrb[5].mxu0  ;;  %187 = vst.msk [vmem:[#allocation8] sm:$0x3] %vm186_vm3, %v180_v19 }
 0x1df   :  { %v183_v21 = vpop.f32.mrb[6].mxu0 }
 0x1e0   :  { %332 = shalt.err (!%p329_p0)
}
 0x1e1   :  { %s333_s16 = scalar_lea.hbm %s467_s6, 32 }
 0x1e2   :  { %p334_p1 = scmp.ne.s32.totalorder %s467_s6, %s333_s16  ;;  %p337_p2 = scmp.lt.u32.totalorder %s333_s16, %s467_s6 }
 0x1e4   :  { %p339_p3 = pnand %p337_p2, %p334_p1 }
 0x1e6   :  { %342 = shalt.err (!%p339_p3)
}
 0x1e7   :  { %209 = dma.vmem_to_hbm [thread:$0]  %s207_s14, 32, %s467_s6, [#allocation9]   ;;  %v246_v22 = vpop.f32.mrb[7].mxu0 }
 0x1e8   :  { %347 = dma.done.wait [#allocation4], 64  }
 0x1e9   :  { %348 = vsyncadd [#allocation4], 4294967232 }
 0x1ea   :  { %349 = dma.done.wait [#allocation9], 32  }
 0x1eb   :  { %350 = vsyncadd [#allocation9], 4294967264 }
 0x1ec   :  { %218 = vsyncpa [#allocation3], 1 }
 0x1ed   :  { %219 = vsyncpa [#allocation6], 1 }
 0x1ee   :  { %220 = vsyncpa [#allocation4], 1 }
 0x1ef   :  { %221 = vsyncpa [#allocation9], 1 }

</bundles_post_ra>
